<compile_context>
chip_gen: v7x
topology: tpu7x:2x2x1
jax: 0.10.0
libtpu: 0.0.40
codegen_flags: <defaults>
</compile_context>

<pallas_src>
import jax
import jax.numpy as jnp
from jax import lax
from jax.experimental import pallas as pl
from jax.experimental.pallas import tpu as pltpu

IGNORE_INDEX = -100
IMAGE_TOKEN_INDEX = 32000
IMAGE_PAD_INDEX = 32001
NUM_IMAGE_PATCHES = 576

NEG_INF = -1e30  # used to mask padded vocab columns (exp underflows to exactly 0)


def _round_up(x, m):
    return (x + m - 1) // m * m


# ----------------------- LM-head matmul kernel (logits path) -----------------------

def _lm_head_kernel(h_ref, w_ref, o_ref):
    # h: (tm, H) bf16, w: (H, tn) bf16 -> o: (tm, tn), f32 accumulation on the MXU
    o_ref[...] = jnp.dot(
        h_ref[...], w_ref[...], preferred_element_type=jnp.float32
    ).astype(o_ref.dtype)


def lm_head(hidden, w, out_dtype=jnp.bfloat16, tm=128, tn=128):
    """hidden: (R, H) bf16, w: (H, V) bf16 -> logits (R, V).  M/N tiled, padded."""
    R, H = hidden.shape
    H2, V = w.shape
    assert H == H2
    R_pad = _round_up(R, tm)
    V_pad = _round_up(V, tn)
    if R_pad != R:
        hidden = jnp.pad(hidden, ((0, R_pad - R), (0, 0)))
    if V_pad != V:
        w = jnp.pad(w, ((0, 0), (0, V_pad - V)))
    num_m, num_v = R_pad // tm, V_pad // tn

    cost = pl.CostEstimate(
        flops=2 * R_pad * H * V_pad,
        transcendentals=0,
        bytes_accessed=R_pad * H * 2 + num_m * H * V_pad * 2 + R_pad * V_pad * 2,
    )
    out = pl.pallas_call(
        _lm_head_kernel,
        out_shape=jax.ShapeDtypeStruct((R_pad, V_pad), out_dtype),
        grid=(num_m, num_v),
        in_specs=[
            pl.BlockSpec((tm, H), lambda i, j: (i, 0)),
            pl.BlockSpec((H, tn), lambda i, j: (0, j)),
        ],
        out_specs=pl.BlockSpec((tm, tn), lambda i, j: (i, j)),
        compiler_params=pltpu.CompilerParams(
            dimension_semantics=("parallel", "parallel")
        ),
        cost_estimate=cost,
    )(hidden, w)
    return out[:R, :V]


# --------------- Fused LM-head + shifted cross-entropy (score_text path) -----------

def fused_score_rows(hidden, w, row_labels, tm=256, tn=512):
    """Per-row cross entropy without materializing logits.

    hidden: (R, H) bf16, w: (H, V) bf16, row_labels: (R,) int (IGNORE_INDEX allowed).
    Returns (R,) f32 per-row loss; rows with label == IGNORE_INDEX get 0.0.
    """
    R, H = hidden.shape
    H2, V = w.shape
    assert H == H2
    tn = min(tn, _round_up(V, 128))
    tm = min(tm, _round_up(R, 128))
    R_pad = _round_up(R, tm)
    V_pad = _round_up(V, tn)
    if R_pad != R:
        hidden = jnp.pad(hidden, ((0, R_pad - R), (0, 0)))
        row_labels = jnp.pad(
            row_labels, (0, R_pad - R), constant_values=IGNORE_INDEX
        )
    if V_pad != V:
        w = jnp.pad(w, ((0, 0), (0, V_pad - V)))
    num_m, num_v = R_pad // tm, V_pad // tn
    labels2d = row_labels.reshape(R_pad, 1).astype(jnp.int32)

    def kernel(h_ref, w_ref, lbl_ref, loss_ref, m_sc, l_sc, g_sc):
        j = pl.program_id(1)  # vocab tile (reduction axis, last in grid)

        @pl.when(j == 0)
        def _():
            m_sc[...] = jnp.full(m_sc.shape, -jnp.inf, jnp.float32)
            l_sc[...] = jnp.zeros(l_sc.shape, jnp.float32)
            g_sc[...] = jnp.zeros(g_sc.shape, jnp.float32)

        # (tm, tn) f32 logits tile on the MXU; full logits never reach HBM.
        logits = jnp.dot(
            h_ref[...], w_ref[...], preferred_element_type=jnp.float32
        )
        col = lax.broadcasted_iota(jnp.int32, (tm, tn), 1)  # local vocab ids
        if V_pad != V:  # static check; masks the padded vocab columns
            logits = jnp.where(col + j * tn < V, logits, NEG_INF)

        # Online logsumexp across vocab tiles (running max / running sum).
        m_prev = m_sc[...]
        m_new = jnp.maximum(m_prev, jnp.max(logits, axis=-1, keepdims=True))
        l_sc[...] = (
            jnp.exp(m_prev - m_new) * l_sc[...]
            + jnp.sum(jnp.exp(logits - m_new), axis=-1, keepdims=True)
        )
        m_sc[...] = m_new

        # Label-logit gather restricted to this vocab tile (one-hot compare).
        lbl = lbl_ref[...]                       # (tm, 1) int32
        onehot = col == (lbl - j * tn)           # never matches IGNORE_INDEX rows
        g_sc[...] += jnp.sum(jnp.where(onehot, logits, 0.0), axis=-1, keepdims=True)

        @pl.when(j == pl.num_programs(1) - 1)
        def _():
            valid = lbl != IGNORE_INDEX
            loss = jnp.where(
                valid, m_sc[...] + jnp.log(l_sc[...]) - g_sc[...], 0.0
            )
            loss_ref[...] = loss                 # single epilogue write per row tile

    cost = pl.CostEstimate(
        flops=2 * R_pad * H * V_pad,
        transcendentals=R_pad * V_pad,
        bytes_accessed=R_pad * H * 2 + num_m * H * V_pad * 2 + R_pad * 4 + R_pad * 4,
    )
    out = pl.pallas_call(
        kernel,
        out_shape=jax.ShapeDtypeStruct((R_pad, 1), jnp.float32),
        grid=(num_m, num_v),
        in_specs=[
            pl.BlockSpec((tm, H), lambda i, j: (i, 0)),   # hidden rows (resident per i)
            pl.BlockSpec((H, tn), lambda i, j: (0, j)),   # weight vocab tile
            pl.BlockSpec((tm, 1), lambda i, j: (i, 0)),   # row labels (resident per i)
        ],
        out_specs=pl.BlockSpec((tm, 1), lambda i, j: (i, 0)),
        scratch_shapes=[
            pltpu.VMEM((tm, 1), jnp.float32),  # running max
            pltpu.VMEM((tm, 1), jnp.float32),  # running sum of exp
            pltpu.VMEM((tm, 1), jnp.float32),  # gathered label logit
        ],
        compiler_params=pltpu.CompilerParams(
            dimension_semantics=("parallel", "arbitrary")
        ),
        cost_estimate=cost,
    )(hidden, w, labels2d)
    return out[:R, 0]


# ----------------------------------- JAX glue ---------------------------------------

def build_labels(input_ids, num_tokens):
    """Mirror of the torch label construction (image-token expansion + scatter)."""
    B, S = input_ids.shape
    image_token_mask = input_ids == IMAGE_TOKEN_INDEX
    valid_text = (~image_token_mask) & (input_ids != IMAGE_PAD_INDEX)
    new_token_positions = (
        jnp.cumsum(image_token_mask.astype(jnp.int32) * (NUM_IMAGE_PATCHES - 1) + 1, -1) - 1
    )
    labels = jnp.full((B, num_tokens), IGNORE_INDEX, dtype=jnp.int32)
    b_idx = jnp.broadcast_to(jnp.arange(B)[:, None], (B, S))
    safe_pos = jnp.where(valid_text, new_token_positions, num_tokens)  # OOB -> dropped
    labels = labels.at[b_idx, safe_pos].set(input_ids.astype(jnp.int32), mode="drop")
    return labels


def score_text(input_ids, embed_table, lm_w, tm=256, tn=512):
    """GenerativeWrapper.score_text with a synthetic (embedding + LM-head) model."""
    B, S = input_ids.shape
    V, H = embed_table.shape

    # Model stand-in: embedding lookup (glue); the LM head is fused into the CE kernel.
    ids_for_embed = jnp.where(input_ids >= V, 0, input_ids)
    hidden = jnp.take(embed_table, ids_for_embed, axis=0).astype(jnp.bfloat16)  # (B,S,H)
    labels = build_labels(input_ids, S)                                          # (B,S)

    # Shift the LABELS instead of slicing the logits: row t scores label t+1, the
    # last row gets ignore_index -> no [B, T-1, V] logits copy is ever made.
    shifted = jnp.concatenate(
        [labels[:, 1:], jnp.full((B, 1), IGNORE_INDEX, jnp.int32)], axis=1
    )
    per_row = fused_score_rows(
        hidden.reshape(B * S, H), lm_w, shifted.reshape(B * S), tm=tm, tn=tn
    ).reshape(B, S)

    valid = shifted != IGNORE_INDEX
    # Precondition (same as the torch module): each sequence has >=1 valid label,
    # otherwise this masked mean divides by zero.
    return per_row.sum(-1) / valid.sum(-1).astype(jnp.float32)


def score_single_tokens(input_ids, embed_table, lm_w, candidate_ids):
    """GenerativeWrapper.score_single_tokens: softmax over last-position logits."""
    B, S = input_ids.shape
    V, H = embed_table.shape
    ids_for_embed = jnp.where(input_ids >= V, 0, input_ids)
    hidden_last = jnp.take(embed_table, ids_for_embed[:, -1], axis=0).astype(jnp.bfloat16)
    logits = lm_head(hidden_last, lm_w, out_dtype=jnp.float32)     # (B, V), tiled kernel
    probs = jax.nn.softmax(logits, axis=-1)
    return probs[:, candidate_ids]


def score_text_reference(input_ids, embed_table, lm_w):
    """Pure-JAX reference mirroring the torch semantics (f32 logits)."""
    B, S = input_ids.shape
    V, H = embed_table.shape
    ids_for_embed = jnp.where(input_ids >= V, 0, input_ids)
    hidden = jnp.take(embed_table, ids_for_embed, axis=0).astype(jnp.bfloat16)
    logits = jnp.einsum("bsh,hv->bsv", hidden, lm_w, preferred_element_type=jnp.float32)
    labels = build_labels(input_ids, S)

    lg = logits[:, :-1, :]
    lbl = labels[:, 1:]
    lse = jax.scipy.special.logsumexp(lg, axis=-1)
    gathered = jnp.take_along_axis(lg, jnp.clip(lbl, 0, V - 1)[..., None], axis=-1)[..., 0]
    valid = lbl != IGNORE_INDEX
    loss = jnp.where(valid, lse - gathered, 0.0)
    return loss.sum(-1) / valid.sum(-1)


# ------------------------------------- main ------------------------------------------

if __name__ == "__main__":
    key = jax.random.PRNGKey(0)
    # Small shapes chosen so the kernels exercise: 2 row tiles (tm=128), 3 vocab tiles
    # (tn=128) with a padded vocab remainder, and the ignore_index path.
    B, S, H, V = 2, 72, 64, 320

    k1, k2, k3 = jax.random.split(key, 3)
    embed_table = jax.random.normal(k1, (V, H), jnp.float32) * 0.5
    lm_w = (jax.random.normal(k2, (H, V), jnp.float32) * 0.5).astype(jnp.bfloat16)

    input_ids = jax.random.randint(k3, (B, S), 2, 100, dtype=jnp.int32)
    # exercise the ignore_index path (pad tokens never get a label -> -100 survives)
    input_ids = input_ids.at[:, 3].set(IMAGE_PAD_INDEX)

    # forward() logits path: tiled LM-head kernel
    ids_for_embed = jnp.where(input_ids >= V, 0, input_ids)
    hidden = jnp.take(embed_table, ids_for_embed, axis=0).astype(jnp.bfloat16)
    logits = jax.block_until_ready(lm_head(hidden.reshape(B * S, H), lm_w))
    ref_logits = jnp.einsum(
        "rh,hv->rv", hidden.reshape(B * S, H), lm_w, preferred_element_type=jnp.float32
    )
    assert logits.shape == (B * S, V)
    assert jnp.allclose(logits.astype(jnp.float32), ref_logits, atol=1e-1, rtol=5e-2)

    # score_single_tokens path: last-position softmax gather over candidate ids
    cand = jnp.array([5, 17, 42], jnp.int32)
    single = jax.block_until_ready(score_single_tokens(input_ids, embed_table, lm_w, cand))
    ref_single = jax.nn.softmax(
        jnp.einsum("bh,hv->bv", hidden[:, -1, :], lm_w,
                   preferred_element_type=jnp.float32), axis=-1)[:, cand]
    assert single.shape == (B, cand.shape[0])
    assert jnp.allclose(single, ref_single, atol=1e-3, rtol=1e-2)

    # score_text path: fused LM-head + shifted masked cross-entropy (2 row tiles,
    # 3 vocab tiles with padded remainder -> exercises the online-LSE masking).
    scores = jax.block_until_ready(
        score_text(input_ids, embed_table, lm_w, tm=128, tn=128)
    )
    ref = jax.block_until_ready(score_text_reference(input_ids, embed_table, lm_w))

    assert scores.shape == (B,)
    assert jnp.all(jnp.isfinite(scores))
    assert jnp.allclose(scores, ref, atol=2e-2, rtol=2e-2), (scores, ref)

    print("KERNEL_OK")
</pallas_src>

<mosaic_0001>
module attributes {stable_mosaic.version = 11 : i64} {
  func.func @_lm_head_kernel(%arg0: i32, %arg1: i32, %arg2: memref<128x64xbf16, #tpu.memory_space<vmem>>, %arg3: memref<64x128xbf16, #tpu.memory_space<vmem>>, %arg4: memref<128x128xbf16, #tpu.memory_space<vmem>>) attributes {dimension_semantics = [#tpu.dimension_semantics<parallel>, #tpu.dimension_semantics<parallel>], iteration_bounds = array<i64: 2, 3>, scalar_prefetch = 0 : i64, scratch_operands = 0 : i64, tpu.core_type = #tpu.core_type<tc>, window_params = [{transform_indices = @transform_0, window_bounds = array<i64: 128, 64>}, {transform_indices = @transform_1, window_bounds = array<i64: 64, 128>}, {transform_indices = @transform_2, window_bounds = array<i64: 128, 128>}]} {
    %c0 = arith.constant 0 : index
    %c0_0 = arith.constant 0 : index
    %0 = vector.load %arg2[%c0, %c0_0] : memref<128x64xbf16, #tpu.memory_space<vmem>>, vector<128x64xbf16>
    %c0_1 = arith.constant 0 : index
    %c0_2 = arith.constant 0 : index
    %1 = vector.load %arg3[%c0_1, %c0_2] : memref<64x128xbf16, #tpu.memory_space<vmem>>, vector<64x128xbf16>
    %cst = arith.constant dense<0.000000e+00> : vector<128x128xf32>
    %2 = tpu.matmul %0, %1, %cst {dimension_numbers = #tpu.dot_dimension_numbers<[1], [0], [0], [1], [0, 0, 1, 1], [], []>} : vector<128x64xbf16>, vector<64x128xbf16>, vector<128x128xf32> -> vector<128x128xf32>
    %3 = arith.truncf %2 : vector<128x128xf32> to vector<128x128xbf16>
    %c0_3 = arith.constant 0 : index
    %c0_4 = arith.constant 0 : index
    %4 = vector.load %arg4[%c0_3, %c0_4] : memref<128x128xbf16, #tpu.memory_space<vmem>>, vector<128x128xbf16>
    tpu.vector_store %arg4[%c0_3, %c0_4], %3 {strides = array<i32>} : memref<128x128xbf16, #tpu.memory_space<vmem>>, vector<128x128xbf16>,
    return
  }
  func.func @transform_0(%arg0: i32, %arg1: i32) -> (i32, i32) {
    %c0_i32 = arith.constant 0 : i32
    %c0_i32_0 = arith.constant 0 : i32
    return %arg0, %c0_i32 : i32, i32
  }
  func.func @transform_1(%arg0: i32, %arg1: i32) -> (i32, i32) {
    %c0_i32 = arith.constant 0 : i32
    %c0_i32_0 = arith.constant 0 : i32
    return %c0_i32, %arg1 : i32, i32
  }
  func.func @transform_2(%arg0: i32, %arg1: i32) -> (i32, i32) {
    %c0_i32 = arith.constant 0 : i32
    return %arg0, %arg1 : i32, i32
  }
}

</mosaic_0001>

<bundles_post_ra>
// kernel: tpu_custom_call.1
= control target key start
LH: loop header
LB: loop body
LE: loop exit
PB: predicated region body
PF: predicated region fallthrough
CT: control target
= control target key end

     0   :  { %7 = vsyncpa [#allocation4], 0  ;;  %s1227_s0 = inlined_call_operand.vmem [shape: bf16[256,64], index: 0, kind: input, shape index: {}]   ;;  %s1228_s1 = inlined_call_operand.vmem [shape: bf16[64,384], index: 1, kind: input, shape index: {}]   ;;  %s1229_s2 = inlined_call_operand.hbm [shape: bf16[256,384], index: 2, kind: output, shape index: {}]  }
   0x1   :  { %9 = vsyncpa [#allocation4 + $0x1], 0  ;;  %s1042_s9 = smov 0   ;;  %s1044_s10 = smov 0  }
   0x2   :  { %s1046_s11 = smov 0   ;;  %s1048_s12 = smov 0  }
   0x3   :  { %s1050_s13 = smov 0   ;;  %s1052_s14 = smov 0  }
   0x4   :  { %s1054_s15 = smov 0   ;;  %s1056_s16 = smov 0  }
   0x5   :  { %s1058_s17 = smov 0   ;;  %s1060_s18 = smov 0  }
   0x6 LB: > { %s648_s19 = sadd.s32 4294967295, %s1021_s18   ;;  %s649_s20 = sadd.s32 4294967294, %s1021_s18   ;;  %s1021_s18 = sphi %s1060_s18, %s15_s18   ;;  %s1017_s17 = sphi %s1058_s17, %s1241_s17   ;;  %s1013_s16 = sphi %s1056_s16, %s1240_s16   ;;  %s1009_s15 = sphi %s1054_s15, %s1239_s15   ;;  %s1005_s14 = sphi %s1052_s14, %s1238_s14   ;;  %s1001_s13 = sphi %s1050_s13, %s1237_s13   ;;  %s997_s12 = sphi %s1048_s12, %s1236_s12   ;;  %s993_s11 = sphi %s1046_s11, %s1235_s11   ;;  %s989_s10 = sphi %s1044_s10, %s1234_s10   ;;  %s985_s9 = sphi %s1042_s9, %s1233_s9  }
   0x7   : > { %s24_s21 = sadd.s32 1, %s1013_s16  ;;  %s27_s22 = sadd.s32 1, %s1017_s17 }
   0x8   : > { %p25_p0 = scmp.ge.s32.totalorder %s24_s21, 3  ;;  %s60_s23 = sadd.s32 1, %s1001_s13 }
   0x9   : > { %p67_p1 = scmp.ne.s32.totalorder %s1001_s13, %s997_s12  ;;  %p68_p2 = scmp.eq.s32.totalorder %s1021_s18, 0 }
   0xa   : > { %s1243_s21 = smov (%p25_p0, %s24_s21), 0  ;;  %s1245_s22 = smov (!%p25_p0, %s27_s22), %s1017_s17 }
   0xb   : > { %s57_s24 = ssub.s32 %s1013_s16, %s1243_s21  ;;  %p1105_p3 = por %p68_p2, %p67_p1 }
   0xc   : > { %p29_p4 = scmp.ge.s32.totalorder %s1245_s22, 2  ;;  %p58_p5 = scmp.eq.s32.totalorder %s57_s24, 0 }
   0xd   : > { %s88_s26 = sadd.s32 1, %s993_s11  ;;  %p98_p6 = scmp.ne.s32.totalorder %s993_s11, %s989_s10 }
   0xe   : > { %s1247_s22 = smov (%p29_p4, %s1245_s22), 0  ;;  %p99_p7 = scmp.eq.s32.totalorder %s648_s19, 5 }
   0xf   : > { %s1115_s27 = scalar_select %p58_p5, %s1001_s13, %s60_s23  }
  0x10   : > { %s83_s28 = ssub.s32 %s1017_s17, %s1247_s22  ;;  %p104_p8 = scmp.ne.s32.totalorder %s989_s10, %s985_s9 }
  0x11   : > { %s85_s29 = sor.u32 %s83_s28, %s57_s24  ;;  %p1121_p10 = por %p99_p7, %p98_p6 }
  0x12   : > { %p86_p9 = scmp.eq.s32.totalorder %s85_s29, 0  ;;  %p105_p11 = scmp.eq.s32.totalorder %s649_s20, 5 }
  0x13   : > { %p651_p13 = scmp.ge.s32.totalorder %s1021_s18, 6 }
  0x14   : > { %s1126_s3 = scalar_select %p86_p9, %s993_s11, %s88_s26  }
  0x15   : > { %p1128_p12 = por %p105_p11, %p104_p8  ;;  %121 = sbr.rel (%p651_p13) target bundleno = 37 (0x25), region = 16 }
  0x1c   : > { %133 = sbr.rel (!%p1105_p3) target bundleno = 37 (0x25), region = 24  ;;  %s135_s5 = sand.u32 (%p1105_p3), 1, %s1001_s13  }
  0x1d   : > { %s653_s6 = sshll.u32 (%p1105_p3), %s1013_s16, 2  ;;  %s652_s7 = sshll.u32 (%p1105_p3), %s135_s5, 5 }
  0x1e   : > { %s139_s20 = scalar_lea.vmem (%p1105_p3), %s1228_s1, %s653_s6  ;;  %s137_s23 = scalar_lea.vmem (%p1105_p3), [#allocation2], %s652_s7 }
  0x1f   : > { %v155_v0 = vld [vmem:[%s139_s20] sm:$0xf] (%p1105_p3)  ;;  %v157_v1 = vld [vmem:[%s139_s20 + $0xc] sm:$0xf] (%p1105_p3)  ;;  %v159_v2 = vld [vmem:[%s139_s20 + $0x18] sm:$0xf] (%p1105_p3) }
  0x20   : > { %156 = vst [vmem:[%s137_s23] sm:$0xf] (%p1105_p3), %v155_v0  ;;  %158 = vst [vmem:[%s137_s23 + $0x4] sm:$0xf] (%p1105_p3), %v157_v1  ;;  %v161_v3 = vld [vmem:[%s139_s20 + $0x24] sm:$0xf] (%p1105_p3) }
  0x21   : > { %v163_v4 = vld [vmem:[%s139_s20 + $0x30] sm:$0xf] (%p1105_p3)  ;;  %160 = vst [vmem:[%s137_s23 + $0x8] sm:$0xf] (%p1105_p3), %v159_v2  ;;  %162 = vst [vmem:[%s137_s23 + $0xc] sm:$0xf] (%p1105_p3), %v161_v3 }
  0x22   : > { %164 = vst [vmem:[%s137_s23 + $0x10] sm:$0xf] (%p1105_p3), %v163_v4  ;;  %v165_v5 = vld [vmem:[%s139_s20 + $0x3c] sm:$0xf] (%p1105_p3)  ;;  %v167_v6 = vld [vmem:[%s139_s20 + $0x48] sm:$0xf] (%p1105_p3) }
  0x23   : > { %v169_v7 = vld [vmem:[%s139_s20 + $0x54] sm:$0xf]  ;;  %166 = vst [vmem:[%s137_s23 + $0x14] sm:$0xf] %v165_v5  ;;  %168 = vst [vmem:[%s137_s23 + $0x18] sm:$0xf] %v167_v6 }
  0x24   : > { %170 = vst [vmem:[%s137_s23 + $0x1c] sm:$0xf] %v169_v7 }
  0x25 PF: > { %p654_p0 = scmp.ge.s32.totalorder %s1021_s18, 1  ;;  %p208_p1 = scmp.lt.s32.totalorder %s1021_s18, 7 }
  0x27   : > { %p209_p2 = pnand %p654_p0, %p208_p1 }
  0x28   : > { %s215_s24 = sand.u32 (!%p209_p2), 1, %s997_s12   ;;  %s657_s25 = sshll.u32 (!%p209_p2), %s1009_s15, 4  ;;  %vm337_vm0 = vcmask (!%p209_p2), 523264  }
  0x29   : > { %212 = sbr.rel (%p209_p2) target bundleno = 302 (0x12e), region = 65  ;;  %s655_s26 = sshll.u32 (!%p209_p2), %s215_s24, 5 }
  0x2a   : > { %p242_p3 = scmp.lt.s32.totalorder (!%p209_p2), %s657_s25, 31  ;;  %s217_s28 = scalar_lea.vmem (!%p209_p2), [#allocation2], %s655_s26 }
  0x2b   : > { %v899_v8 = vld [vmem:[%s217_s28] sm:$0xff] (!%p209_p2)   ;;  %v900_v9 = vld [vmem:[%s217_s28 + $0x8] sm:$0xff] (!%p209_p2)   ;;  %v901_v10 = vld [vmem:[%s217_s28 + $0x10] sm:$0xff] (!%p209_p2)   ;;  %s238_s12 = sand.u32 (!%p209_p2), 1, %s989_s10   ;;  %s808_s19 = smul.u32 (!%p209_p2), 48, %s1009_s15 }
  0x2c   : > { %776 = vmatprep.subr.bf16.mxu0 (!%p209_p2), %v899_v8  ;;  %800 = vmatprep.subr.bf16.mxu1 (!%p209_p2), %v899_v8  ;;  %v902_v13 = vld [vmem:[%s217_s28 + $0x18] sm:$0xff] (!%p209_p2)   ;;  %s656_s8 = sshll.u32 (!%p209_p2), %s238_s12, 6  ;;  %s1169_s28 = scalar_lea.sflag (!%p209_p2), [#allocation4], %s238_s12 }
  0x2d   : > { %777 = vmatpush3.bf16.msra.mxu0 (!%p209_p2), %v899_v8  ;;  %804 = vmatpush3.bf16.msra.mxu1 (!%p209_p2), %v899_v8  ;;  %s240_s20 = scalar_lea.vmem (!%p209_p2), [#allocation3], %s656_s8  ;;  %s552_s23 = sadd.s32 (!%p209_p2), %s1005_s14, %s808_s19 }
  0x2e   : > { %778 = vmatprep.subr.bf16.mxu0 (!%p209_p2), %v900_v9  ;;  %801 = vmatprep.subr.bf16.mxu1 (!%p209_p2), %v900_v9  ;;  %s555_s24 = sshll.u32 (!%p209_p2), %s240_s20, 4  ;;  %s1023_s5 = smov (!%p209_p2), [#allocation3]   ;;  %s1160_s24 = int_to_ptr.vmem [resolvable:$true] %s555_s24 }
  0x2f   : > { %s915_s6 = sshll.u32 (!%p209_p2), %s1023_s5, 4  ;;  %s916_s6 = int_to_ptr.vmem [resolvable:$false] %s915_s6 }
  0x30   : > { %s1249_s25 = smov (!%p242_p3, %s657_s25), 31  ;;  %p918_p7 = scmp.lt.s32.totalorder %s1160_s24, %s916_s6 }
  0x31   : > { %s658_s29 = sshll.u32 %s1249_s25, 2  ;;  %779 = vmatpush3.bf16.msra.mxu0 %v900_v9  ;;  %805 = vmatpush3.bf16.msra.mxu1 %v900_v9  ;;  %s698_s25 = sshll.u32 %s552_s23, 6 }
  0x32   : > { %s245_s7 = scalar_lea.vmem %s1227_s0, %s658_s29  ;;  %780 = vmatprep.subr.bf16.mxu0 %v901_v10  ;;  %802 = vmatprep.subr.bf16.mxu1 %v901_v10  ;;  %s1165_s26 = scalar_lea.hbm %s1229_s2, %s698_s25 }
  0x33   : > { %v903_v11 = vld [vmem:[%s245_s7] sm:$0xff]   ;;  %v905_v14 = vld [vmem:[%s245_s7 + $0x8] sm:$0xff]   ;;  %v907_v16 = vld [vmem:[%s245_s7 + $0x10] sm:$0xff]   ;;  %s911_s29 = scalar_lea.vmem %s1160_s24, 1024 }
  0x34   : > { %v904_v12 = vld [vmem:[%s245_s7 + $0x20] sm:$0xff]   ;;  %784 = vmatprep.mubr.msk.bf16.mxu0 %vm337_vm0, %v903_v11  ;;  %v906_v15 = vld [vmem:[%s245_s7 + $0x28] sm:$0xff]   ;;  %v908_v17 = vld [vmem:[%s245_s7 + $0x30] sm:$0xff]   ;;  %p912_p4 = scmp.ne.s32.totalorder %s1160_s24, %s911_s29 }
  0x35   : > { %792 = vmatprep.mubr.msk.bf16.mxu1 %vm337_vm0, %v904_v12  ;;  %781 = vmatpush3.bf16.msra.mxu0 %v901_v10  ;;  %v909_v18 = vld [vmem:[%s245_s7 + $0x18] sm:$0xff]  }
  0x36   : > { %806 = vmatpush3.bf16.msra.mxu1 %v901_v10  ;;  %782 = vmatprep.subr.bf16.mxu0 %v902_v13  ;;  %v910_v19 = vld [vmem:[%s245_s7 + $0x38] sm:$0xff]   ;;  %p913_p5 = pnand %p912_p4, %p1121_p10  ;;  %s917_s7 = scalar_lea.vmem %s916_s6, 2048 }
  0x37   : > { %803 = vmatprep.subr.bf16.mxu1 %v902_v13  ;;  %p919_p8 = scmp.lt.s32.totalorder %s917_s7, %s911_s29 }
  0x38   : > { %p914_p6 = pneg %p913_p5 }
  0x39   : > { %783 = vmatpush3.bf16.msra.mxu0 %v902_v13  ;;  %p920_p9 = por %p919_p8, %p918_p7 }
  0x3a   : > { %807 = vmatpush3.bf16.msra.mxu1 %v902_v13 }
  0x3b   : > { %p921_p11 = pnand %p920_p9, %p914_p6 }
  0x3c   : > { %785 = vmatmul.mubr.msk.bf16.vlgmr.msra.gmra.mrb[0].mxu0 %vm337_vm0, %v905_v14 }
  0x3d   : > { %793 = vmatmul.mubr.msk.bf16.vlgmr.msra.gmra.mrb[0].mxu1 %vm337_vm0, %v906_v15  ;;  %788 = vmatprep.mubr.msk.bf16.mxu0 %vm337_vm0, %v907_v16 }
  0x3e   : > { %796 = vmatprep.mubr.msk.bf16.mxu1 %vm337_vm0, %v908_v17 }
  0x44   : > { %789 = vmatmul.mubr.msk.bf16.gmra.mrb[4].mxu0 %vm337_vm0, %v909_v18 }
  0x45   : > { %797 = vmatmul.mubr.msk.bf16.gmra.mrb[4].mxu1 %vm337_vm0, %v910_v19 }
 0x10f   : > { %v786_v20 = vpop.f32.mrb[0].mxu0 }
 0x110   : > { %v794_v21 = vpop.f32.mrb[0].mxu1  ;;  %v396_v22 = vpop.f32.mrb[1].mxu0 }
 0x111   : > { %v428_v23 = vpop.f32.mrb[1].mxu1  ;;  %v787_v24 = vpop.f32.mrb[2].mxu0 }
 0x112   : > { %v795_v25 = vpop.f32.mrb[2].mxu1  ;;  %v725_v26 = vpack.c.bf16 %v787_v24, %v786_v20  ;;  %v399_v28 = vpop.f32.mrb[3].mxu0 }
 0x113   : > { %v745_v27 = vpack.c.bf16 %v795_v25, %v794_v21  ;;  %v431_v29 = vpop.f32.mrb[3].mxu1  ;;  %v720_v30 = vpack.c.bf16 %v399_v28, %v396_v22 }
 0x114   : > { %v740_v31 = vpack.c.bf16 %v431_v29, %v428_v23  ;;  %757 = vst [vmem:[%s240_s20 + $0x8] sm:$0xff] %v725_v26  }
 0x115   : > { %761 = vst [vmem:[%s240_s20 + $0x28] sm:$0xff] %v745_v27   ;;  %721 = vst [vmem:[%s240_s20] sm:$0xff] %v720_v30  }
 0x116   : > { %760 = vst [vmem:[%s240_s20 + $0x20] sm:$0xff] %v740_v31  }
 0x117   : > { %v790_v32 = vpop.f32.mrb[4].mxu0 }
 0x118   : > { %v798_v33 = vpop.f32.mrb[4].mxu1  ;;  %v412_v34 = vpop.f32.mrb[5].mxu0 }
 0x119   : > { %v444_v35 = vpop.f32.mrb[5].mxu1  ;;  %v791_v36 = vpop.f32.mrb[6].mxu0 }
 0x11a   : > { %v799_v37 = vpop.f32.mrb[6].mxu1  ;;  %v735_v38 = vpack.c.bf16 %v791_v36, %v790_v32  ;;  %v415_v40 = vpop.f32.mrb[7].mxu0 }
 0x11b   : > { %v755_v39 = vpack.c.bf16 %v799_v37, %v798_v33  ;;  %v447_v41 = vpop.f32.mrb[7].mxu1  ;;  %v730_v42 = vpack.c.bf16 %v415_v40, %v412_v34 }
 0x11c   : > { %v750_v43 = vpack.c.bf16 %v447_v41, %v444_v35  ;;  %759 = vst [vmem:[%s240_s20 + $0x18] sm:$0xff] %v735_v38  }
 0x11d   : > { %763 = vst [vmem:[%s240_s20 + $0x38] sm:$0xff] %v755_v39   ;;  %758 = vst [vmem:[%s240_s20 + $0x10] sm:$0xff] %v730_v42  }
 0x11e   : > { %762 = vst [vmem:[%s240_s20 + $0x30] sm:$0xff] %v750_v43  }
 0x11f   : > { %924 = shalt.err (!%p921_p11)
}
 0x120   : > { %s925_s12 = scalar_lea.hbm %s1165_s26, 1024  ;;  %s929_s20 = scalar_lea.hbm %s1229_s2, 6144 }
 0x121   : > { %p926_p13 = scmp.ne.s32.totalorder %s1165_s26, %s925_s12  ;;  %p930_p2 = scmp.lt.u32.totalorder %s1165_s26, %s1229_s2 }
 0x122   : > { %p931_p3 = scmp.lt.u32.totalorder %s929_s20, %s925_s12  ;;  %p933_p5 = scmp.lt.u32.totalorder %s925_s12, %s1165_s26 }
 0x123   : > { %p927_p0 = pnand %p926_p13, %p1121_p10 }
 0x124   : > { %p932_p4 = por %p931_p3, %p930_p2 }
 0x125   : > { %p928_p1 = pneg %p927_p0 }
 0x126   : > { %p934_p6 = por %p933_p5, %p932_p4 }
 0x128   : > { %p935_p7 = pnand %p934_p6, %p928_p1 }
 0x12a   : > { %938 = shalt.err (!%p935_p7)
}
 0x12b   : > { %s1024_s14 = smov 64   ;;  %s1025_s15 = smov 192  }
 0x12c   : > { %s1026_s29 = smov 4  }
 0x12d   : > { %809 = dma.vmem_to_hbm [thread:$0]  (%p1121_p10), %s1160_s24, 1024, %s1165_s26, %s1169_s28, %s1024_s14, %s1025_s15, %s1026_s29  }
 0x12e PF: > { %p815_p8 = scmp.ge.s32.totalorder %s1021_s18, 2  ;;  %s570_s5 = sand.u32 1, %s985_s9  }
 0x12f   : > { %s571_s6 = scalar_lea.sflag [#allocation4], %s570_s5 }
 0x130   : > { %p812_p9 = pnand %p815_p8, %p1128_p12 }
 0x132   : > { %980 = dma.done.wait (!%p812_p9), %s571_s6, 1024  }
 0x133   : > { %982 = vsyncadd (!%p812_p9), %s571_s6, 4294966272  ;;  %s15_s18 = sadd.s32 1, %s1021_s18   ;;  %s1233_s9 = smov %s989_s10 }
 0x134   : > { %p12_p11 = scmp.ge.s32.totalorder %s15_s18, 8   ;;  %s1234_s10 = smov %s993_s11 }
 0x135   : > { %s1235_s11 = smov %s1126_s3  ;;  %s1236_s12 = smov %s1001_s13 }
 0x136   : > { %s1237_s13 = smov %s1115_s27  ;;  %s1238_s14 = smov %s1013_s16 }
 0x137   : > { %s1239_s15 = smov %s1017_s17  ;;  %s1240_s16 = smov %s1243_s21 }
 0x138   : > { %s1241_s17 = smov %s1247_s22  ;;  %14 = sbr.rel (!%p12_p11) target bundleno = 6 (0x6), region = 112 }
 0x13f   :  { %576 = vsyncpa [#allocation4], 1 }
 0x140   :  { %578 = vsyncpa [#allocation4 + $0x1], 1 }

</bundles_post_ra>
